<compile_context>
chip_gen: v6e
topology: v6e:2x2x1
jax: 0.10.0
libtpu: 0.0.40
codegen_flags: <defaults>
</compile_context>

<pallas_src>
import functools
import math

import jax
import jax.numpy as jnp
from jax import lax
from jax.experimental import pallas as pl
from jax.experimental.pallas import tpu as pltpu

LANE = 128
SUBLANE = 8
_LN_EPS = 1e-5
_FUSED_VMEM_BUDGET = 40 << 20   # above this resident estimate -> stream layers
_VMEM_LIMIT_CAP = 64 << 20      # conservative cross-generation cap (v7x physical)


def _round_up(n, m):
    return ((n + m - 1) // m) * m


# ---------------------------------------------------------------------------
# Shared per-layer math: Linear -> LayerNorm -> Dropout(eval=id) -> ReLU
# ---------------------------------------------------------------------------
def _linear_ln_relu(a, w, b, g, be, inv_h, eps):
    # bf16 MXU operands, f32 accumulation.  Padded lanes of `a` are 0 and the
    # padded weight rows/cols + bias are 0, so padded lanes of `y` are exactly 0.
    y = jnp.dot(a.astype(w.dtype), w, preferred_element_type=jnp.float32) + b
    # Single-pass LayerNorm statistics over the true hidden_size features:
    # padded lanes contribute 0 to both sums, so no mask is needed, and the two
    # reductions are independent (shorter dependency chain than two-pass form).
    sum_y = jnp.sum(y, axis=-1, keepdims=True)
    sum_y2 = jnp.sum(y * y, axis=-1, keepdims=True)
    mean = sum_y * inv_h
    var = jnp.maximum(sum_y2 * inv_h - mean * mean, 0.0)
    scale = lax.rsqrt(var + eps) * g          # fold gamma into rsqrt (EUP slot)
    # gamma == 0 and beta == 0 on padded lanes -> padded outputs stay 0.
    return jnp.maximum((y - mean) * scale + be, 0.0)


# ---------------------------------------------------------------------------
# Fused kernel: all hidden layers + optional head in one grid step
# ---------------------------------------------------------------------------
def _fused_mlp_kernel(*refs, n_layers, h_true, eps, has_head):
    x_ref, w0_ref, b0_ref, g0_ref, be0_ref = refs[0:5]
    idx = 5
    if n_layers > 1:
        wr_ref, br_ref, gr_ref, ber_ref = refs[idx:idx + 4]
        idx += 4
    if has_head:
        wh_ref, bh_ref = refs[idx:idx + 2]
        idx += 2
    o_ref = refs[idx]

    inv_h = 1.0 / float(h_true)
    a = _linear_ln_relu(x_ref[...], w0_ref[...], b0_ref[...],
                        g0_ref[...], be0_ref[...], inv_h, eps)

    if n_layers > 1:
        n_rest = n_layers - 1
        if n_rest <= 4:
            # Short stacks: static unroll, activation stays in vregs.
            for l in range(n_rest):
                a = _linear_ln_relu(a, wr_ref[l], br_ref[l], gr_ref[l],
                                    ber_ref[l], inv_h, eps)
        else:
            # Long stacks: bounded code size / vreg live ranges.
            def body(l, a):
                return _linear_ln_relu(a, wr_ref[l], br_ref[l], gr_ref[l],
                                       ber_ref[l], inv_h, eps)
            a = lax.fori_loop(0, n_rest, body, a)

    if has_head:
        wh = wh_ref[...]
        a = jnp.dot(a.astype(wh.dtype), wh,
                    preferred_element_type=jnp.float32) + bh_ref[...]

    o_ref[...] = a.astype(o_ref.dtype)


# ---------------------------------------------------------------------------
# Streaming kernel: layer grid axis, activation persists in a VMEM scratch
# ---------------------------------------------------------------------------
def _streaming_mlp_kernel(*refs, n_layers, h_true, eps, has_head):
    if has_head:
        (x_ref, w0_ref, b0_ref, g0_ref, be0_ref,
         wr_ref, br_ref, gr_ref, ber_ref, wh_ref, bh_ref,
         o_ref, acc_ref) = refs
    else:
        (x_ref, w0_ref, b0_ref, g0_ref, be0_ref,
         wr_ref, br_ref, gr_ref, ber_ref,
         o_ref, acc_ref) = refs

    inv_h = 1.0 / float(h_true)
    l = pl.program_id(1)

    @pl.when(l == 0)
    def _():
        acc_ref[...] = _linear_ln_relu(x_ref[...], w0_ref[...], b0_ref[...],
                                       g0_ref[...], be0_ref[...], inv_h, eps)

    @pl.when(l > 0)
    def _():
        acc_ref[...] = _linear_ln_relu(acc_ref[...], wr_ref[0], br_ref[0],
                                       gr_ref[0], ber_ref[0], inv_h, eps)

    @pl.when(l == n_layers - 1)
    def _():
        a = acc_ref[...]
        if has_head:
            wh = wh_ref[...]
            a = jnp.dot(a.astype(wh.dtype), wh,
                        preferred_element_type=jnp.float32) + bh_ref[...]
        o_ref[...] = a.astype(o_ref.dtype)


# ---------------------------------------------------------------------------
# Parameter construction (mirrors xavier_init in the PyTorch spec).
# Weights stored as [in, out] (transposed vs torch), zero-padded to 128-lane
# multiples, and cast to `weight_dtype` (bf16 by default: MXU-native).
# ---------------------------------------------------------------------------
def build_params(key, input_size, hidden_size, n_layers, output_size,
                 weight_dtype=jnp.bfloat16):
    Kp = _round_up(input_size, LANE)
    Hp = _round_up(hidden_size, LANE)
    has_head = output_size is not None
    Op = _round_up(output_size, LANE) if has_head else None

    def xavier(k, fan_in, fan_out, pad_in, pad_out):
        std = math.sqrt(2.0 / (fan_in + fan_out))     # nn.init.xavier_normal_
        w = std * jax.random.normal(k, (fan_in, fan_out), dtype=jnp.float32)
        wp = jnp.zeros((pad_in, pad_out), jnp.float32).at[:fan_in, :fan_out].set(w)
        return wp.astype(weight_dtype)

    keys = jax.random.split(key, n_layers + 1)
    # LayerNorm weight = 1 on real features, 0 on padded lanes (keeps pads at 0).
    gamma = (jnp.arange(Hp) < hidden_size).astype(jnp.float32).reshape(1, Hp)

    params = {
        "w0": xavier(keys[0], input_size, hidden_size, Kp, Hp),
        "b0": jnp.zeros((1, Hp), jnp.float32),          # Linear bias init 0
        "g0": gamma,                                     # LayerNorm weight
        "be0": jnp.zeros((1, Hp), jnp.float32),          # LayerNorm bias
        "cfg": {"input_size": input_size, "hidden_size": hidden_size,
                "output_size": output_size, "n_layers": n_layers,
                "Kp": Kp, "Hp": Hp, "Op": Op},
    }
    if n_layers > 1:
        L1 = n_layers - 1
        params["wr"] = jnp.stack(
            [xavier(keys[i + 1], hidden_size, hidden_size, Hp, Hp)
             for i in range(L1)])
        params["br"] = jnp.zeros((L1, 1, Hp), jnp.float32)
        params["gr"] = jnp.broadcast_to(gamma[None], (L1, 1, Hp))
        params["ber"] = jnp.zeros((L1, 1, Hp), jnp.float32)
    if has_head:
        params["wh"] = xavier(keys[n_layers], hidden_size, output_size, Hp, Op)
        params["bh"] = jnp.zeros((1, Op), jnp.float32)
    return params


# ---------------------------------------------------------------------------
# VMEM accounting (drives fused-vs-streaming choice and vmem_limit_bytes)
# ---------------------------------------------------------------------------
def _estimate_vmem_bytes(bm, Kp, Hp, Op, out_w, n_layers, has_head, wbytes,
                         streaming, single_buffer):
    rep = 1 if single_buffer else 2
    L1 = n_layers - 1
    b = 2 * bm * Kp * 4 + 2 * bm * out_w * 4            # x / out (double-buffered)
    b += rep * (Kp * Hp * wbytes + 3 * Hp * 4)          # layer-0 params
    if has_head:
        b += rep * (Hp * Op * wbytes + Op * 4)
    if L1 > 0:
        if streaming:
            b += 2 * (Hp * Hp * wbytes + 3 * Hp * 4)    # one streamed layer x2 bufs
            b += bm * Hp * 4                            # activation scratch
        else:
            b += rep * L1 * (Hp * Hp * wbytes + 3 * Hp * 4)
    b += 6 * bm * Hp * 4                                # in-kernel f32 temporaries
    return b


def _block_spec(shape, index_map, buffered=None):
    if buffered is None:
        return pl.BlockSpec(shape, index_map)
    return pl.BlockSpec(shape, index_map, pipeline_mode=pl.Buffered(buffered))


# ---------------------------------------------------------------------------
# pallas_call wrappers for the two paths
# ---------------------------------------------------------------------------
def _call_fused(xp, params, *, bm, nb, out_w, has_head, single_buffer):
    cfg = params["cfg"]
    Kp, Hp, Op = cfg["Kp"], cfg["Hp"], cfg["Op"]
    n_layers = cfg["n_layers"]
    Bp = xp.shape[0]
    wbytes = jnp.dtype(params["w0"].dtype).itemsize
    buf = 1 if single_buffer else None

    def const_spec(shape):
        return _block_spec(shape, lambda *_: (0,) * len(shape), buf)

    in_specs = [pl.BlockSpec((bm, Kp), lambda i: (i, 0)),
                const_spec((Kp, Hp)), const_spec((1, Hp)),
                const_spec((1, Hp)), const_spec((1, Hp))]
    args = [xp, params["w0"], params["b0"], params["g0"], params["be0"]]
    if n_layers > 1:
        L1 = n_layers - 1
        in_specs += [const_spec((L1, Hp, Hp)), const_spec((L1, 1, Hp)),
                     const_spec((L1, 1, Hp)), const_spec((L1, 1, Hp))]
        args += [params["wr"], params["br"], params["gr"], params["ber"]]
    if has_head:
        in_specs += [const_spec((Hp, Op)), const_spec((1, Op))]
        args += [params["wh"], params["bh"]]

    est = _estimate_vmem_bytes(bm, Kp, Hp, Op, out_w, n_layers, has_head,
                               wbytes, streaming=False,
                               single_buffer=single_buffer)
    vmem_limit = int(min(_VMEM_LIMIT_CAP, max(32 << 20, int(est * 1.5))))

    kernel = functools.partial(_fused_mlp_kernel, n_layers=n_layers,
                               h_true=cfg["hidden_size"], eps=_LN_EPS,
                               has_head=has_head)
    return pl.pallas_call(
        kernel,
        out_shape=jax.ShapeDtypeStruct((Bp, out_w), jnp.float32),
        grid=(nb,),
        in_specs=in_specs,
        out_specs=pl.BlockSpec((bm, out_w), lambda i: (i, 0)),
        compiler_params=pltpu.CompilerParams(
            dimension_semantics=("parallel",),
            vmem_limit_bytes=vmem_limit),
    )(*args)


def _call_streaming(xp, params, *, bm, nb, out_w, has_head, single_buffer):
    cfg = params["cfg"]
    Kp, Hp, Op = cfg["Kp"], cfg["Hp"], cfg["Op"]
    n_layers = cfg["n_layers"]
    Bp = xp.shape[0]
    wbytes = jnp.dtype(params["w0"].dtype).itemsize
    buf = 1 if single_buffer else None

    def const_spec(shape):
        return _block_spec(shape, lambda *_: (0,) * len(shape), buf)

    def layer_spec(shape):
        # Streamed per-layer block: follows the layer grid axis.  Clamped so
        # l==0 prefetches the same block re-used at l==1 (no wasted DMA);
        # default double buffering overlaps next-layer DMA with this matmul.
        nd = len(shape)
        return pl.BlockSpec(
            shape, lambda i, l: (jnp.maximum(l - 1, 0),) + (0,) * (nd - 1))

    in_specs = [pl.BlockSpec((bm, Kp), lambda i, l: (i, 0)),
                const_spec((Kp, Hp)), const_spec((1, Hp)),
                const_spec((1, Hp)), const_spec((1, Hp)),
                layer_spec((1, Hp, Hp)), layer_spec((1, 1, Hp)),
                layer_spec((1, 1, Hp)), layer_spec((1, 1, Hp))]
    args = [xp, params["w0"], params["b0"], params["g0"], params["be0"],
            params["wr"], params["br"], params["gr"], params["ber"]]
    if has_head:
        in_specs += [const_spec((Hp, Op)), const_spec((1, Op))]
        args += [params["wh"], params["bh"]]

    est = _estimate_vmem_bytes(bm, Kp, Hp, Op, out_w, n_layers, has_head,
                               wbytes, streaming=True,
                               single_buffer=single_buffer)
    vmem_limit = int(min(_VMEM_LIMIT_CAP, max(32 << 20, int(est * 1.5))))

    kernel = functools.partial(_streaming_mlp_kernel, n_layers=n_layers,
                               h_true=cfg["hidden_size"], eps=_LN_EPS,
                               has_head=has_head)
    return pl.pallas_call(
        kernel,
        out_shape=jax.ShapeDtypeStruct((Bp, out_w), jnp.float32),
        grid=(nb, n_layers),
        in_specs=in_specs,
        out_specs=pl.BlockSpec((bm, out_w), lambda i, l: (i, 0)),
        scratch_shapes=[pltpu.VMEM((bm, Hp), jnp.float32)],
        compiler_params=pltpu.CompilerParams(
            dimension_semantics=("parallel", "arbitrary"),
            vmem_limit_bytes=vmem_limit),
    )(*args)


# ---------------------------------------------------------------------------
# Forward wrapper
# ---------------------------------------------------------------------------
def linear_module_forward(x, params, *, force_streaming=False):
    cfg = params["cfg"]
    B, in_f = x.shape
    assert in_f == cfg["input_size"]
    Kp, Hp, Op = cfg["Kp"], cfg["Hp"], cfg["Op"]
    n_layers = cfg["n_layers"]
    hidden_size = cfg["hidden_size"]
    output_size = cfg["output_size"]
    has_head = output_size is not None
    out_w = Op if has_head else Hp
    wbytes = jnp.dtype(params["w0"].dtype).itemsize

    # Batch tile: pad to sublanes for small B; for large B use 256-row tiles
    # (full MXU row dim on v6e/v7x) when the activations comfortably fit VMEM.
    if B <= 128:
        bm = _round_up(B, SUBLANE)
    elif 8 * 256 * max(Kp, Hp, out_w) * 4 <= (24 << 20):
        bm = 256
    else:
        bm = 128
    Bp = _round_up(B, bm)
    nb = Bp // bm

    xp = jnp.zeros((Bp, Kp), jnp.float32).at[:B, :in_f].set(x)

    fused_est = _estimate_vmem_bytes(bm, Kp, Hp, Op, out_w, n_layers, has_head,
                                     wbytes, streaming=False, single_buffer=True)
    use_streaming = (n_layers >= 2 and
                     (force_streaming or fused_est > _FUSED_VMEM_BUDGET))

    call = _call_streaming if use_streaming else _call_fused
    run = functools.partial(call, xp, params, bm=bm, nb=nb,
                            out_w=out_w, has_head=has_head)
    try:
        out = run(single_buffer=True)     # Buffered(1) on constant-index blocks
    except Exception:
        out = run(single_buffer=False)    # fallback: default double buffering

    true_out = output_size if has_head else hidden_size
    return out[:B, :true_out]


# ---------------------------------------------------------------------------
# Pure-JAX reference (unpadded) for correctness checks
# ---------------------------------------------------------------------------
def _reference_forward(x, params):
    cfg = params["cfg"]
    H, in_f = cfg["hidden_size"], cfg["input_size"]
    O, L = cfg["output_size"], cfg["n_layers"]

    def w(p, r, c):
        return p.astype(jnp.float32)[:r, :c]

    def ln_relu(y, g, be):
        mean = jnp.mean(y, axis=-1, keepdims=True)
        var = jnp.mean((y - mean) ** 2, axis=-1, keepdims=True)
        return jnp.maximum((y - mean) * lax.rsqrt(var + _LN_EPS) * g + be, 0.0)

    a = ln_relu(x @ w(params["w0"], in_f, H) + params["b0"][:, :H],
                params["g0"][:, :H], params["be0"][:, :H])
    for l in range(L - 1):
        a = ln_relu(a @ w(params["wr"][l], H, H) + params["br"][l][:, :H],
                    params["gr"][l][:, :H], params["ber"][l][:, :H])
    if O is not None:
        a = a @ w(params["wh"], H, O) + params["bh"][:, :O]
    return a


# ---------------------------------------------------------------------------
# Main
# ---------------------------------------------------------------------------
if __name__ == "__main__":
    def check(batch, input_size, hidden_size, n_layers, output_size, seed,
              force_streaming=False):
        key = jax.random.PRNGKey(seed)
        xk, pk = jax.random.split(key)
        x = jax.random.normal(xk, (batch, input_size), dtype=jnp.float32)
        params = build_params(pk, input_size, hidden_size, n_layers, output_size)
        out = jax.block_until_ready(
            linear_module_forward(x, params, force_streaming=force_streaming))
        true_out = output_size if output_size is not None else hidden_size
        assert out.shape == (batch, true_out), out.shape
        assert bool(jnp.all(jnp.isfinite(out))), "non-finite output"
        ref = _reference_forward(x, params)
        err = float(jnp.max(jnp.abs(out - ref)))
        assert err < 5e-2, f"mismatch vs reference: {err}"

    # LinearModule(input_size=32, hidden_size=32, n_layers=2, dp=0.1,
    #              last_bn_enable=True, output_size=16, norm_mode='layer')
    check(8, 32, 32, 2, 16, seed=0)                          # fused path
    check(8, 32, 32, 2, 16, seed=0, force_streaming=True)    # layer-streaming path
    check(16, 24, 48, 3, None, seed=1)                       # no head, 3 layers
    check(8, 32, 32, 1, 16, seed=2)                          # 1 layer (no stack)

    print("KERNEL_OK")
</pallas_src>

<mosaic_0001>
module attributes {stable_mosaic.version = 11 : i64} {
  func.func @_fused_mlp_kernel(%arg0: i32, %arg1: memref<8x128xf32, #tpu.memory_space<vmem>>, %arg2: memref<128x128xbf16, #tpu.memory_space<vmem>>, %arg3: memref<1x128xf32, #tpu.memory_space<vmem>>, %arg4: memref<1x128xf32, #tpu.memory_space<vmem>>, %arg5: memref<1x128xf32, #tpu.memory_space<vmem>>, %arg6: memref<1x128x128xbf16, #tpu.memory_space<vmem>>, %arg7: memref<1x1x128xf32, #tpu.memory_space<vmem>>, %arg8: memref<1x1x128xf32, #tpu.memory_space<vmem>>, %arg9: memref<1x1x128xf32, #tpu.memory_space<vmem>>, %arg10: memref<128x128xbf16, #tpu.memory_space<vmem>>, %arg11: memref<1x128xf32, #tpu.memory_space<vmem>>, %arg12: memref<8x128xf32, #tpu.memory_space<vmem>>) attributes {dimension_semantics = [#tpu.dimension_semantics<parallel>], iteration_bounds = array<i64: 1>, scalar_prefetch = 0 : i64, scratch_operands = 0 : i64, tpu.core_type = #tpu.core_type<tc>, window_params = [{transform_indices = @transform_0, window_bounds = array<i64: 8, 128>}, {pipeline_mode = #tpu.pipeline_mode<synchronous>, transform_indices = @transform_1, window_bounds = array<i64: 128, 128>}, {pipeline_mode = #tpu.pipeline_mode<synchronous>, transform_indices = @transform_2, window_bounds = array<i64: 1, 128>}, {pipeline_mode = #tpu.pipeline_mode<synchronous>, transform_indices = @transform_3, window_bounds = array<i64: 1, 128>}, {pipeline_mode = #tpu.pipeline_mode<synchronous>, transform_indices = @transform_4, window_bounds = array<i64: 1, 128>}, {pipeline_mode = #tpu.pipeline_mode<synchronous>, transform_indices = @transform_5, window_bounds = array<i64: 1, 128, 128>}, {pipeline_mode = #tpu.pipeline_mode<synchronous>, transform_indices = @transform_6, window_bounds = array<i64: 1, 1, 128>}, {pipeline_mode = #tpu.pipeline_mode<synchronous>, transform_indices = @transform_7, window_bounds = array<i64: 1, 1, 128>}, {pipeline_mode = #tpu.pipeline_mode<synchronous>, transform_indices = @transform_8, window_bounds = array<i64: 1, 1, 128>}, {pipeline_mode = #tpu.pipeline_mode<synchronous>, transform_indices = @transform_9, window_bounds = array<i64: 128, 128>}, {pipeline_mode = #tpu.pipeline_mode<synchronous>, transform_indices = @transform_10, window_bounds = array<i64: 1, 128>}, {transform_indices = @transform_11, window_bounds = array<i64: 8, 128>}]} {
    %c0 = arith.constant 0 : index
    %c0_0 = arith.constant 0 : index
    %0 = vector.load %arg1[%c0, %c0_0] : memref<8x128xf32, #tpu.memory_space<vmem>>, vector<8x128xf32>
    %c0_1 = arith.constant 0 : index
    %c0_2 = arith.constant 0 : index
    %1 = vector.load %arg2[%c0_1, %c0_2] : memref<128x128xbf16, #tpu.memory_space<vmem>>, vector<128x128xbf16>
    %c0_3 = arith.constant 0 : index
    %c0_4 = arith.constant 0 : index
    %2 = vector.load %arg3[%c0_3, %c0_4] : memref<1x128xf32, #tpu.memory_space<vmem>>, vector<1x128xf32>
    %c0_5 = arith.constant 0 : index
    %c0_6 = arith.constant 0 : index
    %3 = vector.load %arg4[%c0_5, %c0_6] : memref<1x128xf32, #tpu.memory_space<vmem>>, vector<1x128xf32>
    %c0_7 = arith.constant 0 : index
    %c0_8 = arith.constant 0 : index
    %4 = vector.load %arg5[%c0_7, %c0_8] : memref<1x128xf32, #tpu.memory_space<vmem>>, vector<1x128xf32>
    %5 = arith.truncf %0 : vector<8x128xf32> to vector<8x128xbf16>
    %cst = arith.constant dense<0.000000e+00> : vector<8x128xf32>
    %6 = tpu.matmul %5, %1, %cst {dimension_numbers = #tpu.dot_dimension_numbers<[1], [0], [0], [1], [0, 0, 1, 1], [], []>} : vector<8x128xbf16>, vector<128x128xbf16>, vector<8x128xf32> -> vector<8x128xf32>
    %7 = vector.broadcast %2 : vector<1x128xf32> to vector<8x128xf32>
    %8 = arith.addf %6, %7 : vector<8x128xf32>
    %cst_9 = arith.constant dense<0.000000e+00> : vector<8xf32>
    %9 = vector.multi_reduction <add>, %8, %cst_9 [1] : vector<8x128xf32> to vector<8xf32>
    %10 = vector.shape_cast %9 : vector<8xf32> to vector<8x1xf32>
    %11 = arith.mulf %8, %8 : vector<8x128xf32>
    %cst_10 = arith.constant dense<0.000000e+00> : vector<8xf32>
    %12 = vector.multi_reduction <add>, %11, %cst_10 [1] : vector<8x128xf32> to vector<8xf32>
    %13 = vector.shape_cast %12 : vector<8xf32> to vector<8x1xf32>
    %cst_11 = arith.constant 3.125000e-02 : f32
    %14 = vector.broadcast %cst_11 : f32 to vector<8x1xf32>
    %15 = arith.mulf %10, %14 : vector<8x1xf32>
    %cst_12 = arith.constant 3.125000e-02 : f32
    %16 = vector.broadcast %cst_12 : f32 to vector<8x1xf32>
    %17 = arith.mulf %13, %16 : vector<8x1xf32>
    %18 = arith.mulf %15, %15 : vector<8x1xf32>
    %19 = arith.subf %17, %18 : vector<8x1xf32>
    %cst_13 = arith.constant 0.000000e+00 : f32
    %20 = vector.broadcast %cst_13 : f32 to vector<8x1xf32>
    %21 = arith.maximumf %19, %20 : vector<8x1xf32>
    %cst_14 = arith.constant 9.99999974E-6 : f32
    %22 = vector.broadcast %cst_14 : f32 to vector<8x1xf32>
    %23 = arith.addf %21, %22 : vector<8x1xf32>
    %24 = math.rsqrt %23 : vector<8x1xf32>
    %25 = vector.broadcast %24 : vector<8x1xf32> to vector<8x128xf32>
    %26 = vector.broadcast %3 : vector<1x128xf32> to vector<8x128xf32>
    %27 = arith.mulf %25, %26 : vector<8x128xf32>
    %28 = vector.broadcast %15 : vector<8x1xf32> to vector<8x128xf32>
    %29 = arith.subf %8, %28 : vector<8x128xf32>
    %30 = arith.mulf %29, %27 : vector<8x128xf32>
    %31 = vector.broadcast %4 : vector<1x128xf32> to vector<8x128xf32>
    %32 = arith.addf %30, %31 : vector<8x128xf32>
    %cst_15 = arith.constant 0.000000e+00 : f32
    %33 = vector.broadcast %cst_15 : f32 to vector<8x128xf32>
    %34 = arith.maximumf %32, %33 : vector<8x128xf32>
    %c0_16 = arith.constant 0 : index
    %c0_17 = arith.constant 0 : index
    %c0_18 = arith.constant 0 : index
    %35 = vector.load %arg6[%c0_16, %c0_17, %c0_18] : memref<1x128x128xbf16, #tpu.memory_space<vmem>>, vector<1x128x128xbf16>
    %36 = vector.shape_cast %35 : vector<1x128x128xbf16> to vector<128x128xbf16>
    %c0_19 = arith.constant 0 : index
    %c0_20 = arith.constant 0 : index
    %c0_21 = arith.constant 0 : index
    %37 = vector.load %arg7[%c0_19, %c0_20, %c0_21] : memref<1x1x128xf32, #tpu.memory_space<vmem>>, vector<1x1x128xf32>
    %38 = vector.shape_cast %37 : vector<1x1x128xf32> to vector<1x128xf32>
    %c0_22 = arith.constant 0 : index
    %c0_23 = arith.constant 0 : index
    %c0_24 = arith.constant 0 : index
    %39 = vector.load %arg8[%c0_22, %c0_23, %c0_24] : memref<1x1x128xf32, #tpu.memory_space<vmem>>, vector<1x1x128xf32>
    %40 = vector.shape_cast %39 : vector<1x1x128xf32> to vector<1x128xf32>
    %c0_25 = arith.constant 0 : index
    %c0_26 = arith.constant 0 : index
    %c0_27 = arith.constant 0 : index
    %41 = vector.load %arg9[%c0_25, %c0_26, %c0_27] : memref<1x1x128xf32, #tpu.memory_space<vmem>>, vector<1x1x128xf32>
    %42 = vector.shape_cast %41 : vector<1x1x128xf32> to vector<1x128xf32>
    %43 = arith.truncf %34 : vector<8x128xf32> to vector<8x128xbf16>
    %cst_28 = arith.constant dense<0.000000e+00> : vector<8x128xf32>
    %44 = tpu.matmul %43, %36, %cst_28 {dimension_numbers = #tpu.dot_dimension_numbers<[1], [0], [0], [1], [0, 0, 1, 1], [], []>} : vector<8x128xbf16>, vector<128x128xbf16>, vector<8x128xf32> -> vector<8x128xf32>
    %45 = vector.broadcast %38 : vector<1x128xf32> to vector<8x128xf32>
    %46 = arith.addf %44, %45 : vector<8x128xf32>
    %cst_29 = arith.constant dense<0.000000e+00> : vector<8xf32>
    %47 = vector.multi_reduction <add>, %46, %cst_29 [1] : vector<8x128xf32> to vector<8xf32>
    %48 = vector.shape_cast %47 : vector<8xf32> to vector<8x1xf32>
    %49 = arith.mulf %46, %46 : vector<8x128xf32>
    %cst_30 = arith.constant dense<0.000000e+00> : vector<8xf32>
    %50 = vector.multi_reduction <add>, %49, %cst_30 [1] : vector<8x128xf32> to vector<8xf32>
    %51 = vector.shape_cast %50 : vector<8xf32> to vector<8x1xf32>
    %cst_31 = arith.constant 3.125000e-02 : f32
    %52 = vector.broadcast %cst_31 : f32 to vector<8x1xf32>
    %53 = arith.mulf %48, %52 : vector<8x1xf32>
    %cst_32 = arith.constant 3.125000e-02 : f32
    %54 = vector.broadcast %cst_32 : f32 to vector<8x1xf32>
    %55 = arith.mulf %51, %54 : vector<8x1xf32>
    %56 = arith.mulf %53, %53 : vector<8x1xf32>
    %57 = arith.subf %55, %56 : vector<8x1xf32>
    %cst_33 = arith.constant 0.000000e+00 : f32
    %58 = vector.broadcast %cst_33 : f32 to vector<8x1xf32>
    %59 = arith.maximumf %57, %58 : vector<8x1xf32>
    %cst_34 = arith.constant 9.99999974E-6 : f32
    %60 = vector.broadcast %cst_34 : f32 to vector<8x1xf32>
    %61 = arith.addf %59, %60 : vector<8x1xf32>
    %62 = math.rsqrt %61 : vector<8x1xf32>
    %63 = vector.broadcast %62 : vector<8x1xf32> to vector<8x128xf32>
    %64 = vector.broadcast %40 : vector<1x128xf32> to vector<8x128xf32>
    %65 = arith.mulf %63, %64 : vector<8x128xf32>
    %66 = vector.broadcast %53 : vector<8x1xf32> to vector<8x128xf32>
    %67 = arith.subf %46, %66 : vector<8x128xf32>
    %68 = arith.mulf %67, %65 : vector<8x128xf32>
    %69 = vector.broadcast %42 : vector<1x128xf32> to vector<8x128xf32>
    %70 = arith.addf %68, %69 : vector<8x128xf32>
    %cst_35 = arith.constant 0.000000e+00 : f32
    %71 = vector.broadcast %cst_35 : f32 to vector<8x128xf32>
    %72 = arith.maximumf %70, %71 : vector<8x128xf32>
    %c0_36 = arith.constant 0 : index
    %c0_37 = arith.constant 0 : index
    %73 = vector.load %arg10[%c0_36, %c0_37] : memref<128x128xbf16, #tpu.memory_space<vmem>>, vector<128x128xbf16>
    %74 = arith.truncf %72 : vector<8x128xf32> to vector<8x128xbf16>
    %cst_38 = arith.constant dense<0.000000e+00> : vector<8x128xf32>
    %75 = tpu.matmul %74, %73, %cst_38 {dimension_numbers = #tpu.dot_dimension_numbers<[1], [0], [0], [1], [0, 0, 1, 1], [], []>} : vector<8x128xbf16>, vector<128x128xbf16>, vector<8x128xf32> -> vector<8x128xf32>
    %c0_39 = arith.constant 0 : index
    %c0_40 = arith.constant 0 : index
    %76 = vector.load %arg11[%c0_39, %c0_40] : memref<1x128xf32, #tpu.memory_space<vmem>>, vector<1x128xf32>
    %77 = vector.broadcast %76 : vector<1x128xf32> to vector<8x128xf32>
    %78 = arith.addf %75, %77 : vector<8x128xf32>
    %c0_41 = arith.constant 0 : index
    %c0_42 = arith.constant 0 : index
    %79 = vector.load %arg12[%c0_41, %c0_42] : memref<8x128xf32, #tpu.memory_space<vmem>>, vector<8x128xf32>
    tpu.vector_store %arg12[%c0_41, %c0_42], %78 {strides = array<i32>} : memref<8x128xf32, #tpu.memory_space<vmem>>, vector<8x128xf32>,
    return
  }
  func.func @transform_0(%arg0: i32) -> (i32, i32) {
    %c0_i32 = arith.constant 0 : i32
    %c0_i32_0 = arith.constant 0 : i32
    return %arg0, %c0_i32 : i32, i32
  }
  func.func @transform_1(%arg0: i32) -> (i32, i32) {
    %c0_i32 = arith.constant 0 : i32
    %c0_i32_0 = arith.constant 0 : i32
    %c0_i32_1 = arith.constant 0 : i32
    return %c0_i32, %c0_i32_0 : i32, i32
  }
  func.func @transform_2(%arg0: i32) -> (i32, i32) {
    %c0_i32 = arith.constant 0 : i32
    %c0_i32_0 = arith.constant 0 : i32
    %c0_i32_1 = arith.constant 0 : i32
    return %c0_i32, %c0_i32_0 : i32, i32
  }
  func.func @transform_3(%arg0: i32) -> (i32, i32) {
    %c0_i32 = arith.constant 0 : i32
    %c0_i32_0 = arith.constant 0 : i32
    %c0_i32_1 = arith.constant 0 : i32
    return %c0_i32, %c0_i32_0 : i32, i32
  }
  func.func @transform_4(%arg0: i32) -> (i32, i32) {
    %c0_i32 = arith.constant 0 : i32
    %c0_i32_0 = arith.constant 0 : i32
    %c0_i32_1 = arith.constant 0 : i32
    return %c0_i32, %c0_i32_0 : i32, i32
  }
  func.func @transform_5(%arg0: i32) -> (i32, i32, i32) {
    %c0_i32 = arith.constant 0 : i32
    %c0_i32_0 = arith.constant 0 : i32
    %c0_i32_1 = arith.constant 0 : i32
    %c0_i32_2 = arith.constant 0 : i32
    return %c0_i32, %c0_i32_0, %c0_i32_1 : i32, i32, i32
  }
  func.func @transform_6(%arg0: i32) -> (i32, i32, i32) {
    %c0_i32 = arith.constant 0 : i32
    %c0_i32_0 = arith.constant 0 : i32
    %c0_i32_1 = arith.constant 0 : i32
    %c0_i32_2 = arith.constant 0 : i32
    return %c0_i32, %c0_i32_0, %c0_i32_1 : i32, i32, i32
  }
  func.func @transform_7(%arg0: i32) -> (i32, i32, i32) {
    %c0_i32 = arith.constant 0 : i32
    %c0_i32_0 = arith.constant 0 : i32
    %c0_i32_1 = arith.constant 0 : i32
    %c0_i32_2 = arith.constant 0 : i32
    return %c0_i32, %c0_i32_0, %c0_i32_1 : i32, i32, i32
  }
  func.func @transform_8(%arg0: i32) -> (i32, i32, i32) {
    %c0_i32 = arith.constant 0 : i32
    %c0_i32_0 = arith.constant 0 : i32
    %c0_i32_1 = arith.constant 0 : i32
    %c0_i32_2 = arith.constant 0 : i32
    return %c0_i32, %c0_i32_0, %c0_i32_1 : i32, i32, i32
  }
  func.func @transform_9(%arg0: i32) -> (i32, i32) {
    %c0_i32 = arith.constant 0 : i32
    %c0_i32_0 = arith.constant 0 : i32
    %c0_i32_1 = arith.constant 0 : i32
    return %c0_i32, %c0_i32_0 : i32, i32
  }
  func.func @transform_10(%arg0: i32) -> (i32, i32) {
    %c0_i32 = arith.constant 0 : i32
    %c0_i32_0 = arith.constant 0 : i32
    %c0_i32_1 = arith.constant 0 : i32
    return %c0_i32, %c0_i32_0 : i32, i32
  }
  func.func @transform_11(%arg0: i32) -> (i32, i32) {
    %c0_i32 = arith.constant 0 : i32
    %c0_i32_0 = arith.constant 0 : i32
    return %arg0, %c0_i32 : i32, i32
  }
}

module attributes {stable_mosaic.version = 11 : i64} {
  func.func @_fused_mlp_kernel(%arg0: i32, %arg1: memref<8x128xf32, #tpu.memory_space<vmem>>, %arg2: memref<128x128xbf16, #tpu.memory_space<vmem>>, %arg3: memref<1x128xf32, #tpu.memory_space<vmem>>, %arg4: memref<1x128xf32, #tpu.memory_space<vmem>>, %arg5: memref<1x128xf32, #tpu.memory_space<vmem>>, %arg6: memref<1x128x128xbf16, #tpu.memory_space<vmem>>, %arg7: memref<1x1x128xf32, #tpu.memory_space<vmem>>, %arg8: memref<1x1x128xf32, #tpu.memory_space<vmem>>, %arg9: memref<1x1x128xf32, #tpu.memory_space<vmem>>, %arg10: memref<128x128xbf16, #tpu.memory_space<vmem>>, %arg11: memref<1x128xf32, #tpu.memory_space<vmem>>, %arg12: memref<8x128xf32, #tpu.memory_space<vmem>>) attributes {dimension_semantics = [#tpu.dimension_semantics<parallel>], iteration_bounds = array<i64: 1>, scalar_prefetch = 0 : i64, scratch_operands = 0 : i64, tpu.core_type = #tpu.core_type<tc>, window_params = [{transform_indices = @transform_0, window_bounds = array<i64: 8, 128>}, {pipeline_mode = #tpu.pipeline_mode<synchronous>, transform_indices = @transform_1, window_bounds = array<i64: 128, 128>}, {pipeline_mode = #tpu.pipeline_mode<synchronous>, transform_indices = @transform_2, window_bounds = array<i64: 1, 128>}, {pipeline_mode = #tpu.pipeline_mode<synchronous>, transform_indices = @transform_3, window_bounds = array<i64: 1, 128>}, {pipeline_mode = #tpu.pipeline_mode<synchronous>, transform_indices = @transform_4, window_bounds = array<i64: 1, 128>}, {pipeline_mode = #tpu.pipeline_mode<synchronous>, transform_indices = @transform_5, window_bounds = array<i64: 1, 128, 128>}, {pipeline_mode = #tpu.pipeline_mode<synchronous>, transform_indices = @transform_6, window_bounds = array<i64: 1, 1, 128>}, {pipeline_mode = #tpu.pipeline_mode<synchronous>, transform_indices = @transform_7, window_bounds = array<i64: 1, 1, 128>}, {pipeline_mode = #tpu.pipeline_mode<synchronous>, transform_indices = @transform_8, window_bounds = array<i64: 1, 1, 128>}, {pipeline_mode = #tpu.pipeline_mode<synchronous>, transform_indices = @transform_9, window_bounds = array<i64: 128, 128>}, {pipeline_mode = #tpu.pipeline_mode<synchronous>, transform_indices = @transform_10, window_bounds = array<i64: 1, 128>}, {transform_indices = @transform_11, window_bounds = array<i64: 8, 128>}]} {
    %c0 = arith.constant 0 : index
    %c0_0 = arith.constant 0 : index
    %0 = vector.load %arg1[%c0, %c0_0] : memref<8x128xf32, #tpu.memory_space<vmem>>, vector<8x128xf32>
    %c0_1 = arith.constant 0 : index
    %c0_2 = arith.constant 0 : index
    %1 = vector.load %arg2[%c0_1, %c0_2] : memref<128x128xbf16, #tpu.memory_space<vmem>>, vector<128x128xbf16>
    %c0_3 = arith.constant 0 : index
    %c0_4 = arith.constant 0 : index
    %2 = vector.load %arg3[%c0_3, %c0_4] : memref<1x128xf32, #tpu.memory_space<vmem>>, vector<1x128xf32>
    %c0_5 = arith.constant 0 : index
    %c0_6 = arith.constant 0 : index
    %3 = vector.load %arg4[%c0_5, %c0_6] : memref<1x128xf32, #tpu.memory_space<vmem>>, vector<1x128xf32>
    %c0_7 = arith.constant 0 : index
    %c0_8 = arith.constant 0 : index
    %4 = vector.load %arg5[%c0_7, %c0_8] : memref<1x128xf32, #tpu.memory_space<vmem>>, vector<1x128xf32>
    %5 = arith.truncf %0 : vector<8x128xf32> to vector<8x128xbf16>
    %cst = arith.constant dense<0.000000e+00> : vector<8x128xf32>
    %6 = tpu.matmul %5, %1, %cst {dimension_numbers = #tpu.dot_dimension_numbers<[1], [0], [0], [1], [0, 0, 1, 1], [], []>} : vector<8x128xbf16>, vector<128x128xbf16>, vector<8x128xf32> -> vector<8x128xf32>
    %7 = vector.broadcast %2 : vector<1x128xf32> to vector<8x128xf32>
    %8 = arith.addf %6, %7 : vector<8x128xf32>
    %cst_9 = arith.constant dense<0.000000e+00> : vector<8xf32>
    %9 = vector.multi_reduction <add>, %8, %cst_9 [1] : vector<8x128xf32> to vector<8xf32>
    %10 = vector.shape_cast %9 : vector<8xf32> to vector<8x1xf32>
    %11 = arith.mulf %8, %8 : vector<8x128xf32>
    %cst_10 = arith.constant dense<0.000000e+00> : vector<8xf32>
    %12 = vector.multi_reduction <add>, %11, %cst_10 [1] : vector<8x128xf32> to vector<8xf32>
    %13 = vector.shape_cast %12 : vector<8xf32> to vector<8x1xf32>
    %cst_11 = arith.constant 3.125000e-02 : f32
    %14 = vector.broadcast %cst_11 : f32 to vector<8x1xf32>
    %15 = arith.mulf %10, %14 : vector<8x1xf32>
    %cst_12 = arith.constant 3.125000e-02 : f32
    %16 = vector.broadcast %cst_12 : f32 to vector<8x1xf32>
    %17 = arith.mulf %13, %16 : vector<8x1xf32>
    %18 = arith.mulf %15, %15 : vector<8x1xf32>
    %19 = arith.subf %17, %18 : vector<8x1xf32>
    %cst_13 = arith.constant 0.000000e+00 : f32
    %20 = vector.broadcast %cst_13 : f32 to vector<8x1xf32>
    %21 = arith.maximumf %19, %20 : vector<8x1xf32>
    %cst_14 = arith.constant 9.99999974E-6 : f32
    %22 = vector.broadcast %cst_14 : f32 to vector<8x1xf32>
    %23 = arith.addf %21, %22 : vector<8x1xf32>
    %24 = math.rsqrt %23 : vector<8x1xf32>
    %25 = vector.broadcast %24 : vector<8x1xf32> to vector<8x128xf32>
    %26 = vector.broadcast %3 : vector<1x128xf32> to vector<8x128xf32>
    %27 = arith.mulf %25, %26 : vector<8x128xf32>
    %28 = vector.broadcast %15 : vector<8x1xf32> to vector<8x128xf32>
    %29 = arith.subf %8, %28 : vector<8x128xf32>
    %30 = arith.mulf %29, %27 : vector<8x128xf32>
    %31 = vector.broadcast %4 : vector<1x128xf32> to vector<8x128xf32>
    %32 = arith.addf %30, %31 : vector<8x128xf32>
    %cst_15 = arith.constant 0.000000e+00 : f32
    %33 = vector.broadcast %cst_15 : f32 to vector<8x128xf32>
    %34 = arith.maximumf %32, %33 : vector<8x128xf32>
    %c0_16 = arith.constant 0 : index
    %c0_17 = arith.constant 0 : index
    %c0_18 = arith.constant 0 : index
    %35 = vector.load %arg6[%c0_16, %c0_17, %c0_18] : memref<1x128x128xbf16, #tpu.memory_space<vmem>>, vector<1x128x128xbf16>
    %36 = vector.shape_cast %35 : vector<1x128x128xbf16> to vector<128x128xbf16>
    %c0_19 = arith.constant 0 : index
    %c0_20 = arith.constant 0 : index
    %c0_21 = arith.constant 0 : index
    %37 = vector.load %arg7[%c0_19, %c0_20, %c0_21] : memref<1x1x128xf32, #tpu.memory_space<vmem>>, vector<1x1x128xf32>
    %38 = vector.shape_cast %37 : vector<1x1x128xf32> to vector<1x128xf32>
    %c0_22 = arith.constant 0 : index
    %c0_23 = arith.constant 0 : index
    %c0_24 = arith.constant 0 : index
    %39 = vector.load %arg8[%c0_22, %c0_23, %c0_24] : memref<1x1x128xf32, #tpu.memory_space<vmem>>, vector<1x1x128xf32>
    %40 = vector.shape_cast %39 : vector<1x1x128xf32> to vector<1x128xf32>
    %c0_25 = arith.constant 0 : index
    %c0_26 = arith.constant 0 : index
    %c0_27 = arith.constant 0 : index
    %41 = vector.load %arg9[%c0_25, %c0_26, %c0_27] : memref<1x1x128xf32, #tpu.memory_space<vmem>>, vector<1x1x128xf32>
    %42 = vector.shape_cast %41 : vector<1x1x128xf32> to vector<1x128xf32>
    %43 = arith.truncf %34 : vector<8x128xf32> to vector<8x128xbf16>
    %cst_28 = arith.constant dense<0.000000e+00> : vector<8x128xf32>
    %44 = tpu.matmul %43, %36, %cst_28 {dimension_numbers = #tpu.dot_dimension_numbers<[1], [0], [0], [1], [0, 0, 1, 1], [], []>} : vector<8x128xbf16>, vector<128x128xbf16>, vector<8x128xf32> -> vector<8x128xf32>
    %45 = vector.broadcast %38 : vector<1x128xf32> to vector<8x128xf32>
    %46 = arith.addf %44, %45 : vector<8x128xf32>
    %cst_29 = arith.constant dense<0.000000e+00> : vector<8xf32>
    %47 = vector.multi_reduction <add>, %46, %cst_29 [1] : vector<8x128xf32> to vector<8xf32>
    %48 = vector.shape_cast %47 : vector<8xf32> to vector<8x1xf32>
    %49 = arith.mulf %46, %46 : vector<8x128xf32>
    %cst_30 = arith.constant dense<0.000000e+00> : vector<8xf32>
    %50 = vector.multi_reduction <add>, %49, %cst_30 [1] : vector<8x128xf32> to vector<8xf32>
    %51 = vector.shape_cast %50 : vector<8xf32> to vector<8x1xf32>
    %cst_31 = arith.constant 3.125000e-02 : f32
    %52 = vector.broadcast %cst_31 : f32 to vector<8x1xf32>
    %53 = arith.mulf %48, %52 : vector<8x1xf32>
    %cst_32 = arith.constant 3.125000e-02 : f32
    %54 = vector.broadcast %cst_32 : f32 to vector<8x1xf32>
    %55 = arith.mulf %51, %54 : vector<8x1xf32>
    %56 = arith.mulf %53, %53 : vector<8x1xf32>
    %57 = arith.subf %55, %56 : vector<8x1xf32>
    %cst_33 = arith.constant 0.000000e+00 : f32
    %58 = vector.broadcast %cst_33 : f32 to vector<8x1xf32>
    %59 = arith.maximumf %57, %58 : vector<8x1xf32>
    %cst_34 = arith.constant 9.99999974E-6 : f32
    %60 = vector.broadcast %cst_34 : f32 to vector<8x1xf32>
    %61 = arith.addf %59, %60 : vector<8x1xf32>
    %62 = math.rsqrt %61 : vector<8x1xf32>
    %63 = vector.broadcast %62 : vector<8x1xf32> to vector<8x128xf32>
    %64 = vector.broadcast %40 : vector<1x128xf32> to vector<8x128xf32>
    %65 = arith.mulf %63, %64 : vector<8x128xf32>
    %66 = vector.broadcast %53 : vector<8x1xf32> to vector<8x128xf32>
    %67 = arith.subf %46, %66 : vector<8x128xf32>
    %68 = arith.mulf %67, %65 : vector<8x128xf32>
    %69 = vector.broadcast %42 : vector<1x128xf32> to vector<8x128xf32>
    %70 = arith.addf %68, %69 : vector<8x128xf32>
    %cst_35 = arith.constant 0.000000e+00 : f32
    %71 = vector.broadcast %cst_35 : f32 to vector<8x128xf32>
    %72 = arith.maximumf %70, %71 : vector<8x128xf32>
    %c0_36 = arith.constant 0 : index
    %c0_37 = arith.constant 0 : index
    %73 = vector.load %arg10[%c0_36, %c0_37] : memref<128x128xbf16, #tpu.memory_space<vmem>>, vector<128x128xbf16>
    %74 = arith.truncf %72 : vector<8x128xf32> to vector<8x128xbf16>
    %cst_38 = arith.constant dense<0.000000e+00> : vector<8x128xf32>
    %75 = tpu.matmul %74, %73, %cst_38 {dimension_numbers = #tpu.dot_dimension_numbers<[1], [0], [0], [1], [0, 0, 1, 1], [], []>} : vector<8x128xbf16>, vector<128x128xbf16>, vector<8x128xf32> -> vector<8x128xf32>
    %c0_39 = arith.constant 0 : index
    %c0_40 = arith.constant 0 : index
    %76 = vector.load %arg11[%c0_39, %c0_40] : memref<1x128xf32, #tpu.memory_space<vmem>>, vector<1x128xf32>
    %77 = vector.broadcast %76 : vector<1x128xf32> to vector<8x128xf32>
    %78 = arith.addf %75, %77 : vector<8x128xf32>
    %c0_41 = arith.constant 0 : index
    %c0_42 = arith.constant 0 : index
    %79 = vector.load %arg12[%c0_41, %c0_42] : memref<8x128xf32, #tpu.memory_space<vmem>>, vector<8x128xf32>
    tpu.vector_store %arg12[%c0_41, %c0_42], %78 {strides = array<i32>} : memref<8x128xf32, #tpu.memory_space<vmem>>, vector<8x128xf32>,
    return
  }
  func.func @transform_0(%arg0: i32) -> (i32, i32) {
    %c0_i32 = arith.constant 0 : i32
    %c0_i32_0 = arith.constant 0 : i32
    return %arg0, %c0_i32 : i32, i32
  }
  func.func @transform_1(%arg0: i32) -> (i32, i32) {
    %c0_i32 = arith.constant 0 : i32
    %c0_i32_0 = arith.constant 0 : i32
    %c0_i32_1 = arith.constant 0 : i32
    return %c0_i32, %c0_i32_0 : i32, i32
  }
  func.func @transform_2(%arg0: i32) -> (i32, i32) {
    %c0_i32 = arith.constant 0 : i32
    %c0_i32_0 = arith.constant 0 : i32
    %c0_i32_1 = arith.constant 0 : i32
    return %c0_i32, %c0_i32_0 : i32, i32
  }
  func.func @transform_3(%arg0: i32) -> (i32, i32) {
    %c0_i32 = arith.constant 0 : i32
    %c0_i32_0 = arith.constant 0 : i32
    %c0_i32_1 = arith.constant 0 : i32
    return %c0_i32, %c0_i32_0 : i32, i32
  }
  func.func @transform_4(%arg0: i32) -> (i32, i32) {
    %c0_i32 = arith.constant 0 : i32
    %c0_i32_0 = arith.constant 0 : i32
    %c0_i32_1 = arith.constant 0 : i32
    return %c0_i32, %c0_i32_0 : i32, i32
  }
  func.func @transform_5(%arg0: i32) -> (i32, i32, i32) {
    %c0_i32 = arith.constant 0 : i32
    %c0_i32_0 = arith.constant 0 : i32
    %c0_i32_1 = arith.constant 0 : i32
    %c0_i32_2 = arith.constant 0 : i32
    return %c0_i32, %c0_i32_0, %c0_i32_1 : i32, i32, i32
  }
  func.func @transform_6(%arg0: i32) -> (i32, i32, i32) {
    %c0_i32 = arith.constant 0 : i32
    %c0_i32_0 = arith.constant 0 : i32
    %c0_i32_1 = arith.constant 0 : i32
    %c0_i32_2 = arith.constant 0 : i32
    return %c0_i32, %c0_i32_0, %c0_i32_1 : i32, i32, i32
  }
  func.func @transform_7(%arg0: i32) -> (i32, i32, i32) {
    %c0_i32 = arith.constant 0 : i32
    %c0_i32_0 = arith.constant 0 : i32
    %c0_i32_1 = arith.constant 0 : i32
    %c0_i32_2 = arith.constant 0 : i32
    return %c0_i32, %c0_i32_0, %c0_i32_1 : i32, i32, i32
  }
  func.func @transform_8(%arg0: i32) -> (i32, i32, i32) {
    %c0_i32 = arith.constant 0 : i32
    %c0_i32_0 = arith.constant 0 : i32
    %c0_i32_1 = arith.constant 0 : i32
    %c0_i32_2 = arith.constant 0 : i32
    return %c0_i32, %c0_i32_0, %c0_i32_1 : i32, i32, i32
  }
  func.func @transform_9(%arg0: i32) -> (i32, i32) {
    %c0_i32 = arith.constant 0 : i32
    %c0_i32_0 = arith.constant 0 : i32
    %c0_i32_1 = arith.constant 0 : i32
    return %c0_i32, %c0_i32_0 : i32, i32
  }
  func.func @transform_10(%arg0: i32) -> (i32, i32) {
    %c0_i32 = arith.constant 0 : i32
    %c0_i32_0 = arith.constant 0 : i32
    %c0_i32_1 = arith.constant 0 : i32
    return %c0_i32, %c0_i32_0 : i32, i32
  }
  func.func @transform_11(%arg0: i32) -> (i32, i32) {
    %c0_i32 = arith.constant 0 : i32
    %c0_i32_0 = arith.constant 0 : i32
    return %arg0, %c0_i32 : i32, i32
  }
}

</mosaic_0001>

<bundles_post_ra>
// kernel: tpu_custom_call.1
= control target key start
LH: loop header
LB: loop body
LE: loop exit
PB: predicated region body
PF: predicated region fallthrough
CT: control target
= control target key end

     0   :  { %16 = vsyncpa [#allocation3], 0  ;;  %s917_s0 = inlined_call_operand.hbm [shape: f32[8,128], index: 0, kind: input, shape index: {}]   ;;  %s918_s1 = inlined_call_operand.hbm [shape: bf16[128,128], index: 1, kind: input, shape index: {}]   ;;  %s919_s2 = inlined_call_operand.vmem [shape: f32[1,128], index: 2, kind: input, shape index: {}]   ;;  %s920_s3 = inlined_call_operand.vmem [shape: f32[1,128], index: 3, kind: input, shape index: {}]   ;;  %s921_s4 = inlined_call_operand.vmem [shape: f32[1,128], index: 4, kind: input, shape index: {}]   ;;  %s922_s5 = inlined_call_operand.hbm [shape: bf16[1,128,128], index: 5, kind: input, shape index: {}]   ;;  %s923_s6 = inlined_call_operand.vmem [shape: f32[1,1,128], index: 6, kind: input, shape index: {}]   ;;  %s924_s7 = inlined_call_operand.vmem [shape: f32[1,1,128], index: 7, kind: input, shape index: {}]   ;;  %s925_s8 = inlined_call_operand.vmem [shape: f32[1,1,128], index: 8, kind: input, shape index: {}]   ;;  %s926_s9 = inlined_call_operand.hbm [shape: bf16[128,128], index: 9, kind: input, shape index: {}]   ;;  %s927_s10 = inlined_call_operand.vmem [shape: f32[1,128], index: 10, kind: input, shape index: {}]   ;;  %s928_s11 = inlined_call_operand.hbm [shape: f32[8,128], index: 11, kind: output, shape index: {}]  }
   0x1   :  { %17 = vsyncpa [#allocation6], 0 }
   0x2   :  { %18 = vsyncpa [#allocation9], 0 }
   0x3   :  { %19 = vsyncpa [#allocation4], 0  ;;  %s773_s17 = smov [#allocation5]  }
   0x4   :  { %s35_s18 = sshll.u32 %s773_s17, 4  ;;  %s36_s18 = int_to_ptr.vmem [resolvable:$true] %s35_s18 }
   0x5   :  { %s673_s19 = scalar_lea.vmem %s36_s18, 1024  ;;  %p678_p1 = scmp.lt.s32.totalorder %s36_s18, %s36_s18 }
   0x6   :  { %p674_p0 = scmp.ne.s32.totalorder %s36_s18, %s673_s19  ;;  %p679_p2 = scmp.lt.s32.totalorder %s673_s19, %s673_s19 }
   0x8   :  { %p680_p3 = por %p679_p2, %p678_p1 }
   0xa   :  { %p681_p4 = pnand %p680_p3, %p674_p0 }
   0xc   :  { %684 = shalt.err (!%p681_p4)
}
   0xd   :  { %s774_s20 = smov 64   ;;  %s775_s21 = smov 4  }
   0xe   :  { %41 = dma.hbm_to_vmem [thread:$0]  %s918_s1, 1024, %s36_s18, [#allocation6], %s774_s20, %s774_s20, %s775_s21  }
   0xf   :  { %s776_s24 = smov [#allocation2]   ;;  %s777_s26 = smov [#allocation7]  }
  0x10   :  { %s26_s25 = sshll.u32 %s776_s24, 4  ;;  %s53_s27 = sshll.u32 %s777_s26, 4  ;;  %s27_s25 = int_to_ptr.vmem [resolvable:$true] %s26_s25  ;;  %s54_s27 = int_to_ptr.vmem [resolvable:$true] %s53_s27 }
  0x11   :  { %s693_s28 = scalar_lea.vmem %s27_s25, 128  ;;  %p698_p6 = scmp.lt.s32.totalorder %s27_s25, %s27_s25 }
  0x12   :  { %p694_p5 = scmp.ne.s32.totalorder %s27_s25, %s693_s28  ;;  %p699_p7 = scmp.lt.s32.totalorder %s693_s28, %s693_s28 }
  0x14   :  { %p700_p8 = por %p699_p7, %p698_p6 }
  0x16   :  { %p701_p9 = pnand %p700_p8, %p694_p5 }
  0x18   :  { %704 = shalt.err (!%p701_p9)
}
  0x19   :  { %29 = dma.hbm_to_vmem [thread:$0]  %s917_s0, 128, %s27_s25, [#allocation3]  }
  0x1a   :  { %s713_s12 = scalar_lea.vmem %s54_s27, 1024  ;;  %p718_p11 = scmp.lt.s32.totalorder %s54_s27, %s54_s27 }
  0x1b   :  { %p714_p10 = scmp.ne.s32.totalorder %s54_s27, %s713_s12  ;;  %p719_p12 = scmp.lt.s32.totalorder %s713_s12, %s713_s12 }
  0x1d   :  { %p720_p13 = por %p719_p12, %p718_p11 }
  0x1f   :  { %p721_p0 = pnand %p720_p13, %p714_p10 }
  0x21   :  { %724 = shalt.err (!%p721_p0)
}
  0x22   :  { %59 = dma.hbm_to_vmem [thread:$0]  %s922_s5, 1024, %s54_s27, [#allocation6], %s774_s20, %s774_s20, %s775_s21  }
  0x23   :  { %s778_s14 = smov [#allocation8]  }
  0x24   :  { %s71_s15 = sshll.u32 %s778_s14, 4  ;;  %s72_s15 = int_to_ptr.vmem [resolvable:$true] %s71_s15 }
  0x25   :  { %s733_s16 = scalar_lea.vmem %s72_s15, 1024  ;;  %p738_p2 = scmp.lt.s32.totalorder %s72_s15, %s72_s15 }
  0x26   :  { %p734_p1 = scmp.ne.s32.totalorder %s72_s15, %s733_s16  ;;  %p739_p3 = scmp.lt.s32.totalorder %s733_s16, %s733_s16 }
  0x28   :  { %p740_p4 = por %p739_p3, %p738_p2 }
  0x2a   :  { %p741_p5 = pnand %p740_p4, %p734_p1 }
  0x2c   :  { %744 = shalt.err (!%p741_p5)
}
  0x2d   :  { %77 = dma.hbm_to_vmem [thread:$0]  %s926_s9, 1024, %s72_s15, [#allocation9], %s774_s20, %s774_s20, %s775_s21  }
  0x2e   :  { %765 = dma.done.wait [#allocation3], 128  }
  0x2f   :  { %766 = vsyncadd [#allocation3], 4294967168 }
  0x30   :  { %767 = dma.done.wait [#allocation6], 2048  }
  0x31   :  { %768 = vsyncadd [#allocation6], 4294965248 }
  0x32   :  { %769 = dma.done.wait [#allocation9], 1024  }
  0x33   :  { %770 = vsyncadd [#allocation9], 4294966272  ;;  %v779_v0 = vmov 0.0   ;;  %vm780_vm0 = vmmov 0   ;;  %v637_v1 = vld [vmem:[#allocation5 + $0x38] sm:$0xff]   ;;  %v638_v2 = vld [vmem:[#allocation5 + $0x30] sm:$0xff]  }
  0x34   :  { %568 = vmatprep.subr.bf16.mxu0 %v779_v0  ;;  %584 = vmatprep.mubr.msk.bf16.mxu0 %vm780_vm0, %v779_v0  ;;  %v639_v3 = vld [vmem:[#allocation5 + $0x28] sm:$0xff]   ;;  %v640_v4 = vld [vmem:[#allocation5 + $0x20] sm:$0xff]   ;;  %v641_v5 = vld [vmem:[#allocation5 + $0x18] sm:$0xff]   ;;  %s781_s26 = smov [#allocation10]  }
  0x35   :  { %588 = vmatprep.subr.bf16.mxu1 %v779_v0  ;;  %604 = vmatprep.mubr.msk.bf16.mxu1 %vm780_vm0, %v779_v0  ;;  %v642_v6 = vld [vmem:[#allocation5 + $0x10] sm:$0xff]   ;;  %v643_v7 = vld [vmem:[#allocation5 + $0x8] sm:$0xff]   ;;  %v644_v8 = vld [vmem:[#allocation5] sm:$0xff]   ;;  %s499_s27 = sshll.u32 %s781_s26, 4  ;;  %s500_s27 = int_to_ptr.vmem [resolvable:$true] %s499_s27 }
  0x36   :  { %569 = vmatpush3.bf16.msra.mxu0 %v637_v1  ;;  %v93_v9 = vld [vmem:[#allocation2] sm:$0xff]  ;;  %v646_v19 = vld [vmem:[#allocation7 + $0x30] sm:$0xff]   ;;  %v647_v20 = vld [vmem:[#allocation7 + $0x28] sm:$0xff]   ;;  %p750_p7 = scmp.lt.s32.totalorder %s500_s27, %s500_s27 }
  0x37   :  { %570 = vmatprep.subr.bf16.mxu0 %v779_v0  ;;  %v113_v10 = vpack.c.bf16 %v93_v9, %v93_v9  ;;  %v510_v11 = vld [vmem:[%s919_s2] ss:$0 sm:$0xff]  ;;  %v648_v21 = vld [vmem:[#allocation7 + $0x20] sm:$0xff]   ;;  %v650_v23 = vld [vmem:[#allocation7 + $0x10] sm:$0xff]  }
  0x38   :  { %v645_v18 = vld [vmem:[#allocation7 + $0x38] sm:$0xff]   ;;  %v651_v24 = vld [vmem:[#allocation7 + $0x8] sm:$0xff]   ;;  %v652_v25 = vld [vmem:[#allocation7] sm:$0xff]  }
  0x39   :  { %589 = vmatpush3.bf16.msra.mxu1 %v645_v18  ;;  %v649_v22 = vld [vmem:[#allocation7 + $0x18] sm:$0xff]   ;;  %v654_v51 = vld [vmem:[#allocation8 + $0x30] sm:$0xff]   ;;  %v655_v52 = vld [vmem:[#allocation8 + $0x28] sm:$0xff]  }
  0x3a   :  { %571 = vmatpush3.bf16.msra.mxu0 %v638_v2  ;;  %590 = vmatprep.subr.bf16.mxu1 %v779_v0  ;;  %v519_v34 = vld [vmem:[%s920_s3] ss:$0 sm:$0xff]  ;;  %v656_v53 = vld [vmem:[#allocation8 + $0x20] sm:$0xff]   ;;  %v658_v55 = vld [vmem:[#allocation8 + $0x10] sm:$0xff]  }
  0x3b   :  { %572 = vmatprep.subr.bf16.mxu0 %v779_v0  ;;  %v520_v38 = vld [vmem:[%s921_s4] ss:$0 sm:$0xff]  ;;  %v659_v56 = vld [vmem:[#allocation8 + $0x8] sm:$0xff]   ;;  %v660_v57 = vld [vmem:[#allocation8] sm:$0xff]  }
  0x3c   :  { %v521_v43 = vld [vmem:[%s923_s6] ss:$0 sm:$0xff] }
  0x3d   :  { %591 = vmatpush3.bf16.msra.mxu1 %v646_v19  ;;  %v653_v50 = vld [vmem:[#allocation8 + $0x38] sm:$0xff]  }
  0x3e   :  { %573 = vmatpush3.bf16.msra.mxu0 %v639_v3  ;;  %592 = vmatprep.subr.bf16.mxu1 %v779_v0  ;;  %v657_v54 = vld [vmem:[#allocation8 + $0x18] sm:$0xff]  }
  0x3f   :  { %574 = vmatprep.subr.bf16.mxu0 %v779_v0  ;;  %v530_v3 = vld [vmem:[%s924_s7] ss:$0 sm:$0xff]  ;;  %s745_s7 = scalar_lea.vmem %s500_s27, 128 }
  0x40   :  { %p746_p6 = scmp.ne.s32.totalorder %s500_s27, %s745_s7  ;;  %p751_p8 = scmp.lt.s32.totalorder %s745_s7, %s745_s7 }
  0x41   :  { %593 = vmatpush3.bf16.msra.mxu1 %v647_v20 }
  0x42   :  { %575 = vmatpush3.bf16.msra.mxu0 %v640_v4  ;;  %594 = vmatprep.subr.bf16.mxu1 %v779_v0  ;;  %p752_p9 = por %p751_p8, %p750_p7 }
  0x43   :  { %576 = vmatprep.subr.bf16.mxu0 %v779_v0 }
  0x44   :  { %p753_p10 = pnand %p752_p9, %p746_p6 }
  0x45   :  { %595 = vmatpush3.bf16.msra.mxu1 %v648_v21 }
  0x46   :  { %577 = vmatpush3.bf16.msra.mxu0 %v641_v5  ;;  %596 = vmatprep.subr.bf16.mxu1 %v779_v0 }
  0x47   :  { %578 = vmatprep.subr.bf16.mxu0 %v779_v0 }
  0x49   :  { %597 = vmatpush3.bf16.msra.mxu1 %v649_v22 }
  0x4a   :  { %579 = vmatpush3.bf16.msra.mxu0 %v642_v6  ;;  %598 = vmatprep.subr.bf16.mxu1 %v779_v0 }
  0x4b   :  { %580 = vmatprep.subr.bf16.mxu0 %v779_v0 }
  0x4d   :  { %599 = vmatpush3.bf16.msra.mxu1 %v650_v23 }
  0x4e   :  { %581 = vmatpush3.bf16.msra.mxu0 %v643_v7  ;;  %600 = vmatprep.subr.bf16.mxu1 %v779_v0 }
  0x4f   :  { %582 = vmatprep.subr.bf16.mxu0 %v779_v0 }
  0x51   :  { %601 = vmatpush3.bf16.msra.mxu1 %v651_v24 }
  0x52   :  { %583 = vmatpush3.bf16.msra.mxu0 %v644_v8  ;;  %602 = vmatprep.subr.bf16.mxu1 %v779_v0 }
  0x53   :  { %608 = vmatprep.subr.bf16.mxu0 %v779_v0 }
  0x55   :  { %585 = vmatmul.mubr.bf16.vlgmr.msra.gmra.mxu0 %v113_v10  ;;  %603 = vmatpush3.bf16.msra.mxu1 %v652_v25 }
  0x56   :  { %624 = vmatprep.mubr.msk.bf16.mxu0 %vm780_vm0, %v779_v0  ;;  %609 = vmatpush3.bf16.msra.mxu0 %v653_v50 }
  0x57   :  { %610 = vmatprep.subr.bf16.mxu0 %v779_v0 }
  0x5a   :  { %611 = vmatpush3.bf16.msra.mxu0 %v654_v51 }
  0x5b   :  { %612 = vmatprep.subr.bf16.mxu0 %v779_v0 }
  0x5e   :  { %613 = vmatpush3.bf16.msra.mxu0 %v655_v52 }
  0x5f   :  { %614 = vmatprep.subr.bf16.mxu0 %v779_v0 }
  0x62   :  { %615 = vmatpush3.bf16.msra.mxu0 %v656_v53 }
  0x63   :  { %616 = vmatprep.subr.bf16.mxu0 %v779_v0 }
  0x66   :  { %617 = vmatpush3.bf16.msra.mxu0 %v657_v54 }
  0x67   :  { %618 = vmatprep.subr.bf16.mxu0 %v779_v0 }
  0x6a   :  { %619 = vmatpush3.bf16.msra.mxu0 %v658_v55 }
  0x6b   :  { %620 = vmatprep.subr.bf16.mxu0 %v779_v0 }
  0x6e   :  { %621 = vmatpush3.bf16.msra.mxu0 %v659_v56 }
  0x6f   :  { %622 = vmatprep.subr.bf16.mxu0 %v779_v0  ;;  %v531_v0 = vld [vmem:[%s925_s8] ss:$0 sm:$0xff] }
  0x72   :  { %623 = vmatpush3.bf16.msra.mxu0 %v660_v57 }
 0x115   :  { %v202_v12 = vpop.f32.mrf.mxu0 }
 0x116   :  { %v203_v13 = vadd.f32 %v510_v11, %v202_v12  ;;  %v532_v11 = vld [vmem:[%s927_s10] ss:$0 sm:$0xff] }
 0x117   :  { %v586_v14 = vpop.f32.mrf.mxu0 }
 0x118   :  { %208 = vadd.xlane.f32.xlu0 %v203_v13  ;;  %v210_v16 = vmul.f32 %v203_v13, %v203_v13 }
 0x119   :  { %v205_v15 = vpop.f32.mrf.mxu0 }
 0x11b   :  { %v587_v17 = vpop.f32.mrf.mxu0 }
 0x11c   :  { %211 = vadd.xlane.f32.xlu0 %v210_v16 }
 0x1a1   :  { %v209_v26 = vpop.xlane.xlu0 %208 }
 0x1a2   :  { %v213_v27 = vmul.f32 0.03125, %v209_v26 }
 0x1a4   :  { %v215_v29 = vmul.f32 %v213_v27, %v213_v27  ;;  %v227_v36 = vsub.f32 %v203_v13, %v213_v27 }
 0x1a5   :  { %v212_v28 = vpop.xlane.xlu0 %211 }
 0x1a6   :  { %v214_v30 = vmul.f32 0.03125, %v212_v28 }
 0x1a8   :  { %v216_v31 = vsub.f32 %v214_v30, %v215_v29 }
 0x1aa   :  { %v217_v32 = vmax.f32 %v216_v31, 0.0 }
 0x1ac   :  { %v218_v33 = vadd.f32 1e-05, %v217_v32 }
 0x1ae   :  { %661 = vrsqrt.f32 %v218_v33 }
 0x1bb   :  { %v662_v35 = vpop.eup %661 }
 0x1bc   :  { %v226_v37 = vmul.f32 %v662_v35, %v519_v34 }
 0x1be   :  { %v228_v39 = vmul.f32 %v227_v36, %v226_v37 }
 0x1c0   :  { %v235_v40 = vadd.f32 %v520_v38, %v228_v39 }
 0x1c2   :  { %v236_v41 = vmax.f32 %v235_v40, 0.0 }
 0x1c4   :  { %v256_v42 = vpack.c.bf16 %v236_v41, %v236_v41 }
 0x1c6   :  { %605 = vmatmul.mubr.bf16.vlgmr.msra.gmra.mxu1 %v256_v42 }
 0x286   :  { %v345_v44 = vpop.f32.mrf.mxu1 }
 0x287   :  { %v346_v45 = vadd.f32 %v521_v43, %v345_v44 }
 0x288   :  { %v606_v46 = vpop.f32.mrf.mxu1 }
 0x289   :  { %351 = vadd.xlane.f32.xlu1 %v346_v45  ;;  %v353_v48 = vmul.f32 %v346_v45, %v346_v45 }
 0x28a   :  { %v348_v47 = vpop.f32.mrf.mxu1 }
 0x28c   :  { %v607_v49 = vpop.f32.mrf.mxu1 }
 0x28d   :  { %354 = vadd.xlane.f32.xlu1 %v353_v48 }
 0x312   :  { %v352_v58 = vpop.xlane.xlu1 %351 }
 0x313   :  { %v356_v59 = vmul.f32 0.03125, %v352_v58 }
 0x315   :  { %v358_v61 = vmul.f32 %v356_v59, %v356_v59  ;;  %v370_v5 = vsub.f32 %v346_v45, %v356_v59 }
 0x316   :  { %v355_v60 = vpop.xlane.xlu1 %354 }
 0x317   :  { %v357_v62 = vmul.f32 0.03125, %v355_v60 }
 0x319   :  { %v359_v63 = vsub.f32 %v357_v62, %v358_v61 }
 0x31b   :  { %v360_v1 = vmax.f32 %v359_v63, 0.0 }
 0x31d   :  { %v361_v2 = vadd.f32 1e-05, %v360_v1 }
 0x31f   :  { %663 = vrsqrt.f32 %v361_v2 }
 0x32c   :  { %v664_v4 = vpop.eup %663 }
 0x32d   :  { %v369_v6 = vmul.f32 %v664_v4, %v530_v3 }
 0x32f   :  { %v371_v7 = vmul.f32 %v370_v5, %v369_v6 }
 0x331   :  { %v378_v8 = vadd.f32 %v531_v0, %v371_v7 }
 0x333   :  { %v379_v9 = vmax.f32 %v378_v8, 0.0 }
 0x335   :  { %v396_v10 = vpack.c.bf16 %v379_v9, %v379_v9 }
 0x337   :  { %625 = vmatmul.mubr.bf16.vlgmr.msra.gmra.mxu0 %v396_v10 }
 0x3f7   :  { %v486_v12 = vpop.f32.mrf.mxu0 }
 0x3f8   :  { %v487_v13 = vadd.f32 %v532_v11, %v486_v12 }
 0x3f9   :  { %v626_v14 = vpop.f32.mrf.mxu0 }
 0x3fa   :  { %492 = vst [vmem:[#allocation10] sm:$0xff] %v487_v13 }
 0x3fb   :  { %v489_v15 = vpop.f32.mrf.mxu0 }
 0x3fc   :  { %756 = shalt.err (!%p753_p10)
}
 0x3fd   :  { %502 = dma.vmem_to_hbm [thread:$0]  %s500_s27, 128, %s928_s11, [#allocation4]   ;;  %v627_v16 = vpop.f32.mrf.mxu0 }
 0x3fe   :  { %771 = dma.done.wait [#allocation4], 128  }
 0x3ff   :  { %772 = vsyncadd [#allocation4], 4294967168 }
 0x400   :  { %506 = vsyncpa [#allocation3], 1 }
 0x401   :  { %507 = vsyncpa [#allocation6], 1 }
 0x402   :  { %508 = vsyncpa [#allocation9], 1 }
 0x403   :  { %509 = vsyncpa [#allocation4], 1 }

// kernel: tpu_custom_call.1
= control target key start
LH: loop header
LB: loop body
LE: loop exit
PB: predicated region body
PF: predicated region fallthrough
CT: control target
= control target key end

     0   :  { %16 = vsyncpa [#allocation3], 0  ;;  %s917_s0 = inlined_call_operand.hbm [shape: f32[8,128], index: 0, kind: input, shape index: {}]   ;;  %s918_s1 = inlined_call_operand.hbm [shape: bf16[128,128], index: 1, kind: input, shape index: {}]   ;;  %s919_s2 = inlined_call_operand.vmem [shape: f32[1,128], index: 2, kind: input, shape index: {}]   ;;  %s920_s3 = inlined_call_operand.vmem [shape: f32[1,128], index: 3, kind: input, shape index: {}]   ;;  %s921_s4 = inlined_call_operand.vmem [shape: f32[1,128], index: 4, kind: input, shape index: {}]   ;;  %s922_s5 = inlined_call_operand.hbm [shape: bf16[1,128,128], index: 5, kind: input, shape index: {}]   ;;  %s923_s6 = inlined_call_operand.vmem [shape: f32[1,1,128], index: 6, kind: input, shape index: {}]   ;;  %s924_s7 = inlined_call_operand.vmem [shape: f32[1,1,128], index: 7, kind: input, shape index: {}]   ;;  %s925_s8 = inlined_call_operand.vmem [shape: f32[1,1,128], index: 8, kind: input, shape index: {}]   ;;  %s926_s9 = inlined_call_operand.hbm [shape: bf16[128,128], index: 9, kind: input, shape index: {}]   ;;  %s927_s10 = inlined_call_operand.vmem [shape: f32[1,128], index: 10, kind: input, shape index: {}]   ;;  %s928_s11 = inlined_call_operand.hbm [shape: f32[8,128], index: 11, kind: output, shape index: {}]  }
   0x1   :  { %17 = vsyncpa [#allocation6], 0 }
   0x2   :  { %18 = vsyncpa [#allocation9], 0 }
   0x3   :  { %19 = vsyncpa [#allocation4], 0  ;;  %s773_s17 = smov [#allocation5]  }
   0x4   :  { %s35_s18 = sshll.u32 %s773_s17, 4  ;;  %s36_s18 = int_to_ptr.vmem [resolvable:$true] %s35_s18 }
   0x5   :  { %s673_s19 = scalar_lea.vmem %s36_s18, 1024  ;;  %p678_p1 = scmp.lt.s32.totalorder %s36_s18, %s36_s18 }
   0x6   :  { %p674_p0 = scmp.ne.s32.totalorder %s36_s18, %s673_s19  ;;  %p679_p2 = scmp.lt.s32.totalorder %s673_s19, %s673_s19 }
   0x8   :  { %p680_p3 = por %p679_p2, %p678_p1 }
   0xa   :  { %p681_p4 = pnand %p680_p3, %p674_p0 }
   0xc   :  { %684 = shalt.err (!%p681_p4)
}
   0xd   :  { %s774_s20 = smov 64   ;;  %s775_s21 = smov 4  }
   0xe   :  { %41 = dma.hbm_to_vmem [thread:$0]  %s918_s1, 1024, %s36_s18, [#allocation6], %s774_s20, %s774_s20, %s775_s21  }
   0xf   :  { %s776_s24 = smov [#allocation2]   ;;  %s777_s26 = smov [#allocation7]  }
  0x10   :  { %s26_s25 = sshll.u32 %s776_s24, 4  ;;  %s53_s27 = sshll.u32 %s777_s26, 4  ;;  %s27_s25 = int_to_ptr.vmem [resolvable:$true] %s26_s25  ;;  %s54_s27 = int_to_ptr.vmem [resolvable:$true] %s53_s27 }
  0x11   :  { %s693_s28 = scalar_lea.vmem %s27_s25, 128  ;;  %p698_p6 = scmp.lt.s32.totalorder %s27_s25, %s27_s25 }
  0x12   :  { %p694_p5 = scmp.ne.s32.totalorder %s27_s25, %s693_s28  ;;  %p699_p7 = scmp.lt.s32.totalorder %s693_s28, %s693_s28 }
  0x14   :  { %p700_p8 = por %p699_p7, %p698_p6 }
  0x16   :  { %p701_p9 = pnand %p700_p8, %p694_p5 }
  0x18   :  { %704 = shalt.err (!%p701_p9)
}
  0x19   :  { %29 = dma.hbm_to_vmem [thread:$0]  %s917_s0, 128, %s27_s25, [#allocation3]  }
  0x1a   :  { %s713_s12 = scalar_lea.vmem %s54_s27, 1024  ;;  %p718_p11 = scmp.lt.s32.totalorder %s54_s27, %s54_s27 }
  0x1b   :  { %p714_p10 = scmp.ne.s32.totalorder %s54_s27, %s713_s12  ;;  %p719_p12 = scmp.lt.s32.totalorder %s713_s12, %s713_s12 }
  0x1d   :  { %p720_p13 = por %p719_p12, %p718_p11 }
  0x1f   :  { %p721_p0 = pnand %p720_p13, %p714_p10 }
  0x21   :  { %724 = shalt.err (!%p721_p0)
}
  0x22   :  { %59 = dma.hbm_to_vmem [thread:$0]  %s922_s5, 1024, %s54_s27, [#allocation6], %s774_s20, %s774_s20, %s775_s21  }
  0x23   :  { %s778_s14 = smov [#allocation8]  }
  0x24   :  { %s71_s15 = sshll.u32 %s778_s14, 4  ;;  %s72_s15 = int_to_ptr.vmem [resolvable:$true] %s71_s15 }
  0x25   :  { %s733_s16 = scalar_lea.vmem %s72_s15, 1024  ;;  %p738_p2 = scmp.lt.s32.totalorder %s72_s15, %s72_s15 }
  0x26   :  { %p734_p1 = scmp.ne.s32.totalorder %s72_s15, %s733_s16  ;;  %p739_p3 = scmp.lt.s32.totalorder %s733_s16, %s733_s16 }
  0x28   :  { %p740_p4 = por %p739_p3, %p738_p2 }
  0x2a   :  { %p741_p5 = pnand %p740_p4, %p734_p1 }
  0x2c   :  { %744 = shalt.err (!%p741_p5)
}
  0x2d   :  { %77 = dma.hbm_to_vmem [thread:$0]  %s926_s9, 1024, %s72_s15, [#allocation9], %s774_s20, %s774_s20, %s775_s21  }
  0x2e   :  { %765 = dma.done.wait [#allocation3], 128  }
  0x2f   :  { %766 = vsyncadd [#allocation3], 4294967168 }
  0x30   :  { %767 = dma.done.wait [#allocation6], 2048  }
  0x31   :  { %768 = vsyncadd [#allocation6], 4294965248 }
  0x32   :  { %769 = dma.done.wait [#allocation9], 1024  }
  0x33   :  { %770 = vsyncadd [#allocation9], 4294966272  ;;  %v779_v0 = vmov 0.0   ;;  %vm780_vm0 = vmmov 0   ;;  %v637_v1 = vld [vmem:[#allocation5 + $0x38] sm:$0xff]   ;;  %v638_v2 = vld [vmem:[#allocation5 + $0x30] sm:$0xff]  }
  0x34   :  { %568 = vmatprep.subr.bf16.mxu0 %v779_v0  ;;  %584 = vmatprep.mubr.msk.bf16.mxu0 %vm780_vm0, %v779_v0  ;;  %v639_v3 = vld [vmem:[#allocation5 + $0x28] sm:$0xff]   ;;  %v640_v4 = vld [vmem:[#allocation5 + $0x20] sm:$0xff]   ;;  %v641_v5 = vld [vmem:[#allocation5 + $0x18] sm:$0xff]   ;;  %s781_s26 = smov [#allocation10]  }
  0x35   :  { %588 = vmatprep.subr.bf16.mxu1 %v779_v0  ;;  %604 = vmatprep.mubr.msk.bf16.mxu1 %vm780_vm0, %v779_v0  ;;  %v642_v6 = vld [vmem:[#allocation5 + $0x10] sm:$0xff]   ;;  %v643_v7 = vld [vmem:[#allocation5 + $0x8] sm:$0xff]   ;;  %v644_v8 = vld [vmem:[#allocation5] sm:$0xff]   ;;  %s499_s27 = sshll.u32 %s781_s26, 4  ;;  %s500_s27 = int_to_ptr.vmem [resolvable:$true] %s499_s27 }
  0x36   :  { %569 = vmatpush3.bf16.msra.mxu0 %v637_v1  ;;  %v93_v9 = vld [vmem:[#allocation2] sm:$0xff]  ;;  %v646_v19 = vld [vmem:[#allocation7 + $0x30] sm:$0xff]   ;;  %v647_v20 = vld [vmem:[#allocation7 + $0x28] sm:$0xff]   ;;  %p750_p7 = scmp.lt.s32.totalorder %s500_s27, %s500_s27 }
  0x37   :  { %570 = vmatprep.subr.bf16.mxu0 %v779_v0  ;;  %v113_v10 = vpack.c.bf16 %v93_v9, %v93_v9  ;;  %v510_v11 = vld [vmem:[%s919_s2] ss:$0 sm:$0xff]  ;;  %v648_v21 = vld [vmem:[#allocation7 + $0x20] sm:$0xff]   ;;  %v650_v23 = vld [vmem:[#allocation7 + $0x10] sm:$0xff]  }
  0x38   :  { %v645_v18 = vld [vmem:[#allocation7 + $0x38] sm:$0xff]   ;;  %v651_v24 = vld [vmem:[#allocation7 + $0x8] sm:$0xff]   ;;  %v652_v25 = vld [vmem:[#allocation7] sm:$0xff]  }
  0x39   :  { %589 = vmatpush3.bf16.msra.mxu1 %v645_v18  ;;  %v649_v22 = vld [vmem:[#allocation7 + $0x18] sm:$0xff]   ;;  %v654_v51 = vld [vmem:[#allocation8 + $0x30] sm:$0xff]   ;;  %v655_v52 = vld [vmem:[#allocation8 + $0x28] sm:$0xff]  }
  0x3a   :  { %571 = vmatpush3.bf16.msra.mxu0 %v638_v2  ;;  %590 = vmatprep.subr.bf16.mxu1 %v779_v0  ;;  %v519_v34 = vld [vmem:[%s920_s3] ss:$0 sm:$0xff]  ;;  %v656_v53 = vld [vmem:[#allocation8 + $0x20] sm:$0xff]   ;;  %v658_v55 = vld [vmem:[#allocation8 + $0x10] sm:$0xff]  }
  0x3b   :  { %572 = vmatprep.subr.bf16.mxu0 %v779_v0  ;;  %v520_v38 = vld [vmem:[%s921_s4] ss:$0 sm:$0xff]  ;;  %v659_v56 = vld [vmem:[#allocation8 + $0x8] sm:$0xff]   ;;  %v660_v57 = vld [vmem:[#allocation8] sm:$0xff]  }
  0x3c   :  { %v521_v43 = vld [vmem:[%s923_s6] ss:$0 sm:$0xff] }
  0x3d   :  { %591 = vmatpush3.bf16.msra.mxu1 %v646_v19  ;;  %v653_v50 = vld [vmem:[#allocation8 + $0x38] sm:$0xff]  }
  0x3e   :  { %573 = vmatpush3.bf16.msra.mxu0 %v639_v3  ;;  %592 = vmatprep.subr.bf16.mxu1 %v779_v0  ;;  %v657_v54 = vld [vmem:[#allocation8 + $0x18] sm:$0xff]  }
  0x3f   :  { %574 = vmatprep.subr.bf16.mxu0 %v779_v0  ;;  %v530_v3 = vld [vmem:[%s924_s7] ss:$0 sm:$0xff]  ;;  %s745_s7 = scalar_lea.vmem %s500_s27, 128 }
  0x40   :  { %p746_p6 = scmp.ne.s32.totalorder %s500_s27, %s745_s7  ;;  %p751_p8 = scmp.lt.s32.totalorder %s745_s7, %s745_s7 }
  0x41   :  { %593 = vmatpush3.bf16.msra.mxu1 %v647_v20 }
  0x42   :  { %575 = vmatpush3.bf16.msra.mxu0 %v640_v4  ;;  %594 = vmatprep.subr.bf16.mxu1 %v779_v0  ;;  %p752_p9 = por %p751_p8, %p750_p7 }
  0x43   :  { %576 = vmatprep.subr.bf16.mxu0 %v779_v0 }
  0x44   :  { %p753_p10 = pnand %p752_p9, %p746_p6 }
  0x45   :  { %595 = vmatpush3.bf16.msra.mxu1 %v648_v21 }
  0x46   :  { %577 = vmatpush3.bf16.msra.mxu0 %v641_v5  ;;  %596 = vmatprep.subr.bf16.mxu1 %v779_v0 }
  0x47   :  { %578 = vmatprep.subr.bf16.mxu0 %v779_v0 }
  0x49   :  { %597 = vmatpush3.bf16.msra.mxu1 %v649_v22 }
  0x4a   :  { %579 = vmatpush3.bf16.msra.mxu0 %v642_v6  ;;  %598 = vmatprep.subr.bf16.mxu1 %v779_v0 }
  0x4b   :  { %580 = vmatprep.subr.bf16.mxu0 %v779_v0 }
  0x4d   :  { %599 = vmatpush3.bf16.msra.mxu1 %v650_v23 }
  0x4e   :  { %581 = vmatpush3.bf16.msra.mxu0 %v643_v7  ;;  %600 = vmatprep.subr.bf16.mxu1 %v779_v0 }
  0x4f   :  { %582 = vmatprep.subr.bf16.mxu0 %v779_v0 }
  0x51   :  { %601 = vmatpush3.bf16.msra.mxu1 %v651_v24 }
  0x52   :  { %583 = vmatpush3.bf16.msra.mxu0 %v644_v8  ;;  %602 = vmatprep.subr.bf16.mxu1 %v779_v0 }
  0x53   :  { %608 = vmatprep.subr.bf16.mxu0 %v779_v0 }
  0x55   :  { %585 = vmatmul.mubr.bf16.vlgmr.msra.gmra.mxu0 %v113_v10  ;;  %603 = vmatpush3.bf16.msra.mxu1 %v652_v25 }
  0x56   :  { %624 = vmatprep.mubr.msk.bf16.mxu0 %vm780_vm0, %v779_v0  ;;  %609 = vmatpush3.bf16.msra.mxu0 %v653_v50 }
  0x57   :  { %610 = vmatprep.subr.bf16.mxu0 %v779_v0 }
  0x5a   :  { %611 = vmatpush3.bf16.msra.mxu0 %v654_v51 }
  0x5b   :  { %612 = vmatprep.subr.bf16.mxu0 %v779_v0 }
  0x5e   :  { %613 = vmatpush3.bf16.msra.mxu0 %v655_v52 }
  0x5f   :  { %614 = vmatprep.subr.bf16.mxu0 %v779_v0 }
  0x62   :  { %615 = vmatpush3.bf16.msra.mxu0 %v656_v53 }
  0x63   :  { %616 = vmatprep.subr.bf16.mxu0 %v779_v0 }
  0x66   :  { %617 = vmatpush3.bf16.msra.mxu0 %v657_v54 }
  0x67   :  { %618 = vmatprep.subr.bf16.mxu0 %v779_v0 }
  0x6a   :  { %619 = vmatpush3.bf16.msra.mxu0 %v658_v55 }
  0x6b   :  { %620 = vmatprep.subr.bf16.mxu0 %v779_v0 }
  0x6e   :  { %621 = vmatpush3.bf16.msra.mxu0 %v659_v56 }
  0x6f   :  { %622 = vmatprep.subr.bf16.mxu0 %v779_v0  ;;  %v531_v0 = vld [vmem:[%s925_s8] ss:$0 sm:$0xff] }
  0x72   :  { %623 = vmatpush3.bf16.msra.mxu0 %v660_v57 }
 0x115   :  { %v202_v12 = vpop.f32.mrf.mxu0 }
 0x116   :  { %v203_v13 = vadd.f32 %v510_v11, %v202_v12  ;;  %v532_v11 = vld [vmem:[%s927_s10] ss:$0 sm:$0xff] }
 0x117   :  { %v586_v14 = vpop.f32.mrf.mxu0 }
 0x118   :  { %208 = vadd.xlane.f32.xlu0 %v203_v13  ;;  %v210_v16 = vmul.f32 %v203_v13, %v203_v13 }
 0x119   :  { %v205_v15 = vpop.f32.mrf.mxu0 }
 0x11b   :  { %v587_v17 = vpop.f32.mrf.mxu0 }
 0x11c   :  { %211 = vadd.xlane.f32.xlu0 %v210_v16 }
 0x1a1   :  { %v209_v26 = vpop.xlane.xlu0 %208 }
 0x1a2   :  { %v213_v27 = vmul.f32 0.03125, %v209_v26 }
 0x1a4   :  { %v215_v29 = vmul.f32 %v213_v27, %v213_v27  ;;  %v227_v36 = vsub.f32 %v203_v13, %v213_v27 }
 0x1a5   :  { %v212_v28 = vpop.xlane.xlu0 %211 }
 0x1a6   :  { %v214_v30 = vmul.f32 0.03125, %v212_v28 }
 0x1a8   :  { %v216_v31 = vsub.f32 %v214_v30, %v215_v29 }
 0x1aa   :  { %v217_v32 = vmax.f32 %v216_v31, 0.0 }
 0x1ac   :  { %v218_v33 = vadd.f32 1e-05, %v217_v32 }
 0x1ae   :  { %661 = vrsqrt.f32 %v218_v33 }
 0x1bb   :  { %v662_v35 = vpop.eup %661 }
 0x1bc   :  { %v226_v37 = vmul.f32 %v662_v35, %v519_v34 }
 0x1be   :  { %v228_v39 = vmul.f32 %v227_v36, %v226_v37 }
 0x1c0   :  { %v235_v40 = vadd.f32 %v520_v38, %v228_v39 }
 0x1c2   :  { %v236_v41 = vmax.f32 %v235_v40, 0.0 }
 0x1c4   :  { %v256_v42 = vpack.c.bf16 %v236_v41, %v236_v41 }
 0x1c6   :  { %605 = vmatmul.mubr.bf16.vlgmr.msra.gmra.mxu1 %v256_v42 }
 0x286   :  { %v345_v44 = vpop.f32.mrf.mxu1 }
 0x287   :  { %v346_v45 = vadd.f32 %v521_v43, %v345_v44 }
 0x288   :  { %v606_v46 = vpop.f32.mrf.mxu1 }
 0x289   :  { %351 = vadd.xlane.f32.xlu1 %v346_v45  ;;  %v353_v48 = vmul.f32 %v346_v45, %v346_v45 }
 0x28a   :  { %v348_v47 = vpop.f32.mrf.mxu1 }
 0x28c   :  { %v607_v49 = vpop.f32.mrf.mxu1 }
 0x28d   :  { %354 = vadd.xlane.f32.xlu1 %v353_v48 }
 0x312   :  { %v352_v58 = vpop.xlane.xlu1 %351 }
 0x313   :  { %v356_v59 = vmul.f32 0.03125, %v352_v58 }
 0x315   :  { %v358_v61 = vmul.f32 %v356_v59, %v356_v59  ;;  %v370_v5 = vsub.f32 %v346_v45, %v356_v59 }
 0x316   :  { %v355_v60 = vpop.xlane.xlu1 %354 }
 0x317   :  { %v357_v62 = vmul.f32 0.03125, %v355_v60 }
 0x319   :  { %v359_v63 = vsub.f32 %v357_v62, %v358_v61 }
 0x31b   :  { %v360_v1 = vmax.f32 %v359_v63, 0.0 }
 0x31d   :  { %v361_v2 = vadd.f32 1e-05, %v360_v1 }
 0x31f   :  { %663 = vrsqrt.f32 %v361_v2 }
 0x32c   :  { %v664_v4 = vpop.eup %663 }
 0x32d   :  { %v369_v6 = vmul.f32 %v664_v4, %v530_v3 }
 0x32f   :  { %v371_v7 = vmul.f32 %v370_v5, %v369_v6 }
 0x331   :  { %v378_v8 = vadd.f32 %v531_v0, %v371_v7 }
 0x333   :  { %v379_v9 = vmax.f32 %v378_v8, 0.0 }
 0x335   :  { %v396_v10 = vpack.c.bf16 %v379_v9, %v379_v9 }
 0x337   :  { %625 = vmatmul.mubr.bf16.vlgmr.msra.gmra.mxu0 %v396_v10 }
 0x3f7   :  { %v486_v12 = vpop.f32.mrf.mxu0 }
 0x3f8   :  { %v487_v13 = vadd.f32 %v532_v11, %v486_v12 }
 0x3f9   :  { %v626_v14 = vpop.f32.mrf.mxu0 }
 0x3fa   :  { %492 = vst [vmem:[#allocation10] sm:$0xff] %v487_v13 }
 0x3fb   :  { %v489_v15 = vpop.f32.mrf.mxu0 }
 0x3fc   :  { %756 = shalt.err (!%p753_p10)
}
 0x3fd   :  { %502 = dma.vmem_to_hbm [thread:$0]  %s500_s27, 128, %s928_s11, [#allocation4]   ;;  %v627_v16 = vpop.f32.mrf.mxu0 }
 0x3fe   :  { %771 = dma.done.wait [#allocation4], 128  }
 0x3ff   :  { %772 = vsyncadd [#allocation4], 4294967168 }
 0x400   :  { %506 = vsyncpa [#allocation3], 1 }
 0x401   :  { %507 = vsyncpa [#allocation6], 1 }
 0x402   :  { %508 = vsyncpa [#allocation9], 1 }
 0x403   :  { %509 = vsyncpa [#allocation4], 1 }

</bundles_post_ra>
